<compile_context>
chip_gen: v6e
topology: v6e:2x2x1
jax: 0.10.0
libtpu: 0.0.40
codegen_flags: <defaults>
</compile_context>

<pallas_src>
import functools

import jax
import jax.numpy as jnp
from jax.experimental import pallas as pl
from jax.experimental.pallas import tpu as pltpu

_EPS = 1e-5


def _round_up(x, m):
    return ((x + m - 1) // m) * m


def _pick_batch_tile(n, l, lp, c_max, itemsize):
    """Largest divisor of n keeping the MXU M-dim and the VMEM block modest."""
    best = 1
    for d in range(1, n + 1):
        if n % d:
            continue
        if d * l <= 1024 and d * lp * c_max * itemsize <= (8 << 20):
            best = d
    return best


def _vmem_limit(in_block, out_block, weight_bytes, temp_bytes):
    # 2x double-buffered input/output blocks + 2x weights (the pipeline still
    # allocates two buffers for constant index maps) + compute temporaries.
    # TODO(synk): single-buffer the grid-invariant weight specs
    # (pipeline_mode=pl.Buffered(1)) on v7x to reclaim the 2x weight term.
    need = 2 * in_block + 2 * out_block + 2 * weight_bytes + temp_bytes + (2 << 20)
    return int(min(max(need, 16 << 20), 100 << 20))


# ---------------- pass A: conv1 (+adapter conv) + BN1 partial stats ----------
def _pass_a_kernel(x_ref, w1_ref, *rest, K, L, off0, pad_l, use_adapter):
    if use_adapter:
        wa_ref, h1_ref, s1_ref, ident_ref = rest
    else:
        h1_ref, s1_ref = rest
    B, _, Cin = x_ref.shape
    Cout = w1_ref.shape[2]
    x = x_ref[...]                                    # (B, Lp, Cinp) matmul dtype
    base = off0 - pad_l
    acc = jnp.zeros((B * L, Cout), jnp.float32)
    acc_a = jnp.zeros((B * L, Cout), jnp.float32) if use_adapter else None
    # 'same' conv as K accumulated MXU matmuls over the flattened (B*L) rows
    # (no (L, K*C) im2col temporary).
    for k in range(K):
        xs = x[:, base + k:base + k + L, :].reshape(B * L, Cin)
        acc = acc + jnp.dot(xs, w1_ref[k], preferred_element_type=jnp.float32)
        if use_adapter:
            acc_a = acc_a + jnp.dot(xs, wa_ref[k],
                                    preferred_element_type=jnp.float32)
    # conv1 bias dropped on purpose: training-mode BN subtracts the batch mean
    # right after, so it cancels exactly.
    h1_ref[:, off0:off0 + L, :] = acc.reshape(B, L, Cout).astype(h1_ref.dtype)
    # Pad rows of h1 stay uninitialized -- pass B masks them with an iota select.
    s = jnp.sum(acc, axis=0, keepdims=True)
    ss = jnp.sum(acc * acc, axis=0, keepdims=True)
    s1_ref[...] = jnp.concatenate([s, ss], axis=0)[None]
    if use_adapter:
        # Adapter conv shares x and its shifted views; its bias is folded into
        # the BN2 shift in the wrapper.
        ident_ref[...] = acc_a.reshape(B, L, Cout).astype(ident_ref.dtype)


# ------------------- pass B: BN1 + ReLU + conv2 + BN2 stats ------------------
def _pass_b_kernel(h1_ref, sc1_ref, sh1_ref, w2_ref, h2_ref, s2_ref,
                   *, K, L, off0, pad_l, compute_dtype):
    B, Lp, C = h1_ref.shape
    # Folded BN1 (per-channel scale/shift) + ReLU in fp32.
    a = jnp.maximum(h1_ref[...].astype(jnp.float32) * sc1_ref[...]
                    + sh1_ref[...], 0.0)
    # Keep the 'same' pad rows zero for conv2 (they are uninitialized in HBM).
    row = jax.lax.broadcasted_iota(jnp.int32, (1, Lp, 1), 1)
    valid = (row >= off0) & (row < off0 + L)
    a = jnp.where(valid, a, 0.0).astype(compute_dtype)
    base = off0 - pad_l
    acc = jnp.zeros((B * L, C), jnp.float32)
    for k in range(K):
        a_k = a[:, base + k:base + k + L, :].reshape(B * L, C)
        acc = acc + jnp.dot(a_k, w2_ref[k], preferred_element_type=jnp.float32)
    h2_ref[...] = acc.reshape(B, L, C).astype(h2_ref.dtype)
    s = jnp.sum(acc, axis=0, keepdims=True)
    ss = jnp.sum(acc * acc, axis=0, keepdims=True)
    s2_ref[...] = jnp.concatenate([s, ss], axis=0)[None]


# ------------------- pass C: BN2 + residual add + ReLU (VPU only) ------------
def _pass_c_kernel(h2_ref, sc2_ref, sh2_ref, *rest, L, off0, residual,
                   use_adapter):
    y = h2_ref[...].astype(jnp.float32) * sc2_ref[...] + sh2_ref[...]
    if residual:
        if use_adapter:
            ident_ref, o_ref = rest
            y = y + ident_ref[...].astype(jnp.float32)
        else:
            x_ref, o_ref = rest                      # Cin == Cout
            y = y + x_ref[:, off0:off0 + L, :].astype(jnp.float32)
    else:
        (o_ref,) = rest
    o_ref[...] = jnp.maximum(y, 0.0).astype(o_ref.dtype)


# ------------------------------ host-side helpers ----------------------------
def _pad_w(w_kio, cin_p, cout_p):
    K, ci, co = w_kio.shape
    return jnp.pad(w_kio.astype(jnp.float32),
                   ((0, 0), (0, cin_p - ci), (0, cout_p - co)))


def _pad_vec(v, c_p, fill):
    v = jnp.reshape(v.astype(jnp.float32), (1, -1))
    return jnp.pad(v, ((0, 0), (0, c_p - v.shape[1])), constant_values=fill)


def _bn_affine(partial_stats, gamma, beta, count, eps=_EPS):
    """partial_stats: (T, 2, Cp) per-tile [sum, sumsq] -> folded (scale, shift)."""
    s = jnp.sum(partial_stats[:, 0, :], axis=0)
    ss = jnp.sum(partial_stats[:, 1, :], axis=0)
    mean = s / count
    # TODO(synk): E[x^2]-E[x]^2 in fp32 can cancel for large means; a
    # mean-subtracted second pass would be more robust deep in a network.
    var = jnp.maximum(ss / count - mean * mean, 0.0)          # biased variance
    scale = gamma.reshape(-1) * jax.lax.rsqrt(var + eps)
    shift = beta.reshape(-1) - mean * scale
    return scale.reshape(1, -1), shift.reshape(1, -1)


def conv_block_forward(x_ncl, params, *, kernel_size, stride=1, residual=True,
                       matmul_dtype=jnp.bfloat16):
    """x_ncl: (N, Cin, L) float32 (PyTorch layout). Returns (N, Cout, L) float32.

    matmul_dtype controls the MXU operand dtype AND the dtype of the
    inter-pass intermediates (h1 / h2 / adapter identity) in HBM.  bfloat16
    (default) is the right setting on v5e/v6e/v7x; float32 matches the fp32
    reference tightly.
    """
    # TODO(synk): stride=2 / padding=0 (downsampling) branch of the PyTorch
    # module is not implemented; only the stride=1 / padding='same' path is.
    assert stride == 1, "only stride=1 ('same' padding) is implemented"

    N, Cin, L = x_ncl.shape
    K = int(kernel_size)
    Cout = params["w1"].shape[2]
    pad_l = (K - 1) // 2
    pad_r = (K - 1) - pad_l

    itemsize = jnp.dtype(matmul_dtype).itemsize
    align = 8 * (4 // itemsize)                     # 8 rows for f32, 16 for bf16
    off0 = _round_up(pad_l, align) if pad_l else 0  # sublane-aligned data start
    Lp = off0 + L + pad_r

    Cinp = _round_up(Cin, 128)
    Coutp = _round_up(Cout, 128)
    use_adapter = residual and (Cin != Cout)
    if residual and not use_adapter:
        assert Cin == Cout

    B_tile = _pick_batch_tile(N, L, Lp, max(Cinp, Coutp), itemsize)
    n_tiles = N // B_tile

    # NCL -> NLC so channels sit on the 128-lane axis; zero-pad channels to a
    # multiple of 128 and 'same'-pad the length once (real data starts at row
    # off0 so the h1 store is sublane aligned).
    # TODO(synk): keep the surrounding network in NLC (and fold this pad into
    # pass A) to drop the transpose + padded HBM copy.
    x_nlc = jnp.transpose(x_ncl, (0, 2, 1)).astype(matmul_dtype)
    x_pad = jnp.pad(x_nlc, ((0, 0), (off0, pad_r), (0, Cinp - Cin)))

    w1 = _pad_w(params["w1"], Cinp, Coutp).astype(matmul_dtype)
    w2 = _pad_w(params["w2"], Coutp, Coutp).astype(matmul_dtype)
    g1, be1 = _pad_vec(params["g1"], Coutp, 1.0), _pad_vec(params["be1"], Coutp, 0.0)
    g2, be2 = _pad_vec(params["g2"], Coutp, 1.0), _pad_vec(params["be2"], Coutp, 0.0)

    # BlockSpecs: grid over batch tiles only.
    # TODO(synk): add an L-tile grid axis (haloed blocks) so very long
    # sequences still fit v7x's 64 MiB VMEM.
    x_spec = pl.BlockSpec((B_tile, Lp, Cinp), lambda i: (i, 0, 0))
    h1_spec = pl.BlockSpec((B_tile, Lp, Coutp), lambda i: (i, 0, 0))
    h2_spec = pl.BlockSpec((B_tile, L, Coutp), lambda i: (i, 0, 0))
    st_spec = pl.BlockSpec((1, 2, Coutp), lambda i: (i, 0, 0))
    vec_spec = pl.BlockSpec((1, Coutp), lambda i: (0, 0))
    w1_spec = pl.BlockSpec((K, Cinp, Coutp), lambda i: (0, 0, 0))
    w2_spec = pl.BlockSpec((K, Coutp, Coutp), lambda i: (0, 0, 0))
    par = ("parallel",)

    f32 = 4
    blk_x = B_tile * Lp * Cinp * itemsize
    blk_h1 = B_tile * Lp * Coutp * itemsize
    blk_h2 = B_tile * L * Coutp * itemsize
    blk_st = 2 * Coutp * f32
    blk_out = B_tile * L * Coutp * f32
    w1_bytes = K * Cinp * Coutp * itemsize
    w2_bytes = K * Coutp * Coutp * itemsize

    # ---------------- pass A: conv1 (+adapter conv) + BN1 partial stats ------
    ops_a = [x_pad, w1]
    in_specs_a = [x_spec, w1_spec]
    out_specs_a = [h1_spec, st_spec]
    out_shape_a = [jax.ShapeDtypeStruct((N, Lp, Coutp), matmul_dtype),
                   jax.ShapeDtypeStruct((n_tiles, 2, Coutp), jnp.float32)]
    w_bytes_a = w1_bytes
    out_blk_a = blk_h1 + blk_st
    flops_a = 2 * N * L * K * Cinp * Coutp
    if use_adapter:
        wa = _pad_w(params["wa"], Cinp, Coutp).astype(matmul_dtype)
        ops_a.append(wa)
        in_specs_a.append(pl.BlockSpec((K, Cinp, Coutp), lambda i: (0, 0, 0)))
        out_specs_a.append(h2_spec)
        out_shape_a.append(jax.ShapeDtypeStruct((N, L, Coutp), matmul_dtype))
        w_bytes_a += w1_bytes
        out_blk_a += blk_h2
        flops_a *= 2
    temp_a = B_tile * L * (Cinp * itemsize
                           + Coutp * f32 * (2 if use_adapter else 1))

    results_a = pl.pallas_call(
        functools.partial(_pass_a_kernel, K=K, L=L, off0=off0, pad_l=pad_l,
                          use_adapter=use_adapter),
        grid=(n_tiles,),
        in_specs=in_specs_a,
        out_specs=out_specs_a,
        out_shape=out_shape_a,
        compiler_params=pltpu.CompilerParams(
            dimension_semantics=par,
            vmem_limit_bytes=_vmem_limit(blk_x, out_blk_a, w_bytes_a, temp_a)),
        cost_estimate=pl.CostEstimate(
            flops=int(flops_a), transcendentals=0,
            bytes_accessed=int(n_tiles * (blk_x + out_blk_a) + w_bytes_a)),
    )(*ops_a)
    if use_adapter:
        h1_raw, st1, ident = results_a
    else:
        (h1_raw, st1), ident = results_a, None

    sc1, sh1 = _bn_affine(st1, g1, be1, N * L)

    # ---------------- pass B: BN1 + ReLU + conv2 + BN2 partial stats ---------
    temp_b = B_tile * Lp * Coutp * f32 + B_tile * L * Coutp * (itemsize + f32)
    h2_raw, st2 = pl.pallas_call(
        functools.partial(_pass_b_kernel, K=K, L=L, off0=off0, pad_l=pad_l,
                          compute_dtype=matmul_dtype),
        grid=(n_tiles,),
        in_specs=[h1_spec, vec_spec, vec_spec, w2_spec],
        out_specs=[h2_spec, st_spec],
        out_shape=[jax.ShapeDtypeStruct((N, L, Coutp), matmul_dtype),
                   jax.ShapeDtypeStruct((n_tiles, 2, Coutp), jnp.float32)],
        compiler_params=pltpu.CompilerParams(
            dimension_semantics=par,
            vmem_limit_bytes=_vmem_limit(blk_h1 + 2 * Coutp * f32,
                                         blk_h2 + blk_st, w2_bytes, temp_b)),
        cost_estimate=pl.CostEstimate(
            flops=int(2 * N * L * K * Coutp * Coutp + 6 * N * Lp * Coutp),
            transcendentals=0,
            bytes_accessed=int(n_tiles * (blk_h1 + blk_h2 + blk_st) + w2_bytes)),
    )(h1_raw, sc1, sh1, w2)

    sc2, sh2 = _bn_affine(st2, g2, be2, N * L)
    if use_adapter:
        # Adapter bias and BN2 shift are both added pre-ReLU -> fold them.
        sh2 = sh2 + _pad_vec(params["ba"], Coutp, 0.0)

    # ---------------- pass C: BN2 + residual add + ReLU (elementwise) --------
    ops_c = [h2_raw, sc2, sh2]
    specs_c = [h2_spec, vec_spec, vec_spec]
    in_blk_c = blk_h2 + 4 * Coutp * f32
    if residual:
        if use_adapter:
            ops_c.append(ident)
            specs_c.append(h2_spec)
            in_blk_c += blk_h2
        else:
            ops_c.append(x_pad)
            specs_c.append(x_spec)
            in_blk_c += blk_x

    out_pad = pl.pallas_call(
        functools.partial(_pass_c_kernel, L=L, off0=off0, residual=residual,
                          use_adapter=use_adapter),
        grid=(n_tiles,),
        in_specs=specs_c,
        out_specs=h2_spec,
        out_shape=jax.ShapeDtypeStruct((N, L, Coutp), jnp.float32),
        compiler_params=pltpu.CompilerParams(
            dimension_semantics=par,
            vmem_limit_bytes=_vmem_limit(in_blk_c, blk_out, 0,
                                         B_tile * L * Coutp * f32)),
        cost_estimate=pl.CostEstimate(
            flops=int(4 * N * L * Coutp), transcendentals=0,
            bytes_accessed=int(n_tiles * (in_blk_c + blk_out))),
    )(*ops_c)

    # Drop the zero channel padding and return to NCL like PyTorch.
    return jnp.transpose(out_pad[:, :, :Cout], (0, 2, 1)).astype(x_ncl.dtype)


# ------------------------------ pure-JAX reference ---------------------------
def reference_forward(x_ncl, params, K, residual, use_adapter):
    """Independent pure-JAX reference mirroring the PyTorch forward (NCL)."""
    pad_l = (K - 1) // 2
    pad_r = (K - 1) - pad_l

    def conv1d(x, w_kio, b):
        w = jnp.transpose(w_kio, (2, 1, 0))            # -> torch (Cout, Cin, K)
        y = jax.lax.conv_general_dilated(
            x, w, window_strides=(1,), padding=[(pad_l, pad_r)],
            dimension_numbers=("NCH", "OIH", "NCH"))
        return y + b.reshape(1, -1, 1)

    def bn(x, g, be):
        m = jnp.mean(x, axis=(0, 2), keepdims=True)
        v = jnp.mean((x - m) ** 2, axis=(0, 2), keepdims=True)
        xn = (x - m) / jnp.sqrt(v + _EPS)
        return xn * g.reshape(1, -1, 1) + be.reshape(1, -1, 1)

    h = jax.nn.relu(bn(conv1d(x_ncl, params["w1"], params["b1"]),
                       params["g1"], params["be1"]))
    h = bn(conv1d(h, params["w2"], params["b2"]), params["g2"], params["be2"])
    if residual:
        ident = conv1d(x_ncl, params["wa"], params["ba"]) if use_adapter else x_ncl
        h = h + ident
    return jax.nn.relu(h)


if __name__ == "__main__":
    # Small shapes consistent with the module: Conv1d input is (N, Cin, L).
    N, Cin, Cout, L, K = 2, 4, 8, 16, 3
    key = jax.random.PRNGKey(0)
    ks = jax.random.split(key, 7)

    x = jax.random.normal(ks[0], (N, Cin, L), jnp.float32)
    params = {
        "w1": 0.1 * jax.random.normal(ks[1], (K, Cin, Cout), jnp.float32),
        "b1": 0.1 * jax.random.normal(ks[2], (1, Cout), jnp.float32),
        "g1": jnp.ones((1, Cout), jnp.float32),    # BatchNorm default weight
        "be1": jnp.zeros((1, Cout), jnp.float32),  # BatchNorm default bias
        "w2": 0.1 * jax.random.normal(ks[3], (K, Cout, Cout), jnp.float32),
        "b2": 0.1 * jax.random.normal(ks[4], (1, Cout), jnp.float32),
        "g2": jnp.ones((1, Cout), jnp.float32),
        "be2": jnp.zeros((1, Cout), jnp.float32),
        "wa": 0.1 * jax.random.normal(ks[5], (K, Cin, Cout), jnp.float32),  # adapter
        "ba": 0.1 * jax.random.normal(ks[6], (1, Cout), jnp.float32),
    }

    ref = reference_forward(x, params, K, residual=True, use_adapter=True)

    # fp32 MXU + fp32 intermediates -- tight check (adapter path).
    out = conv_block_forward(x, params, kernel_size=K, stride=1, residual=True,
                             matmul_dtype=jnp.float32)
    out = jax.block_until_ready(out)
    assert out.shape == (N, Cout, L), out.shape
    assert jnp.allclose(out, ref, atol=5e-4, rtol=5e-4), \
        float(jnp.max(jnp.abs(out - ref)))

    # fp32, no-adapter residual path (Cin == Cout) -- tight check.
    Cin2 = Cout
    x2 = jax.random.normal(ks[2], (N, Cin2, L), jnp.float32)
    params2 = dict(params)
    params2["w1"] = 0.1 * jax.random.normal(ks[4], (K, Cin2, Cout), jnp.float32)
    ref2 = reference_forward(x2, params2, K, residual=True, use_adapter=False)
    out2 = conv_block_forward(x2, params2, kernel_size=K, stride=1,
                              residual=True, matmul_dtype=jnp.float32)
    out2 = jax.block_until_ready(out2)
    assert out2.shape == (N, Cout, L), out2.shape
    assert jnp.allclose(out2, ref2, atol=5e-4, rtol=5e-4), \
        float(jnp.max(jnp.abs(out2 - ref2)))

    # bf16 MXU operands + bf16 intermediates (default; recommended on TPU) --
    # loose check.
    out_bf16 = conv_block_forward(x, params, kernel_size=K, stride=1,
                                  residual=True)
    out_bf16 = jax.block_until_ready(out_bf16)
    assert out_bf16.shape == (N, Cout, L)
    assert bool(jnp.all(jnp.isfinite(out_bf16)))
    assert jnp.allclose(out_bf16, ref, atol=0.1, rtol=0.05), \
        float(jnp.max(jnp.abs(out_bf16 - ref)))

    print("KERNEL_OK")
</pallas_src>

<mosaic_0001>
module attributes {stable_mosaic.version = 11 : i64} {
  func.func @_pass_a_kernel(%arg0: i32, %arg1: memref<2x25x128xf32, #tpu.memory_space<vmem>>, %arg2: memref<3x128x128xf32, #tpu.memory_space<vmem>>, %arg3: memref<3x128x128xf32, #tpu.memory_space<vmem>>, %arg4: memref<2x25x128xf32, #tpu.memory_space<vmem>>, %arg5: memref<1x2x128xf32, #tpu.memory_space<vmem>>, %arg6: memref<2x16x128xf32, #tpu.memory_space<vmem>>) attributes {dimension_semantics = [#tpu.dimension_semantics<parallel>], iteration_bounds = array<i64: 1>, scalar_prefetch = 0 : i64, scratch_operands = 0 : i64, tpu.core_type = #tpu.core_type<tc>, window_params = [{transform_indices = @transform_0, window_bounds = array<i64: 2, 25, 128>}, {pipeline_mode = #tpu.pipeline_mode<synchronous>, transform_indices = @transform_1, window_bounds = array<i64: 3, 128, 128>}, {pipeline_mode = #tpu.pipeline_mode<synchronous>, transform_indices = @transform_2, window_bounds = array<i64: 3, 128, 128>}, {transform_indices = @transform_3, window_bounds = array<i64: 2, 25, 128>}, {transform_indices = @transform_4, window_bounds = array<i64: 1, 2, 128>}, {transform_indices = @transform_5, window_bounds = array<i64: 2, 16, 128>}]} {
    %c0 = arith.constant 0 : index
    %c0_0 = arith.constant 0 : index
    %c0_1 = arith.constant 0 : index
    %0 = vector.load %arg1[%c0, %c0_0, %c0_1] : memref<2x25x128xf32, #tpu.memory_space<vmem>>, vector<2x25x128xf32>
    %cst = arith.constant 0.000000e+00 : f32
    %1 = vector.broadcast %cst : f32 to vector<32x128xf32>
    %cst_2 = arith.constant 0.000000e+00 : f32
    %2 = vector.broadcast %cst_2 : f32 to vector<32x128xf32>
    %3 = vector.extract_strided_slice %0 {offsets = [0, 7, 0], sizes = [2, 16, 128], strides = [1, 1, 1]} : vector<2x25x128xf32> to vector<2x16x128xf32>
    %4 = vector.shape_cast %3 : vector<2x16x128xf32> to vector<32x128xf32>
    %c0_3 = arith.constant 0 : index
    %c0_4 = arith.constant 0 : index
    %c0_5 = arith.constant 0 : index
    %5 = vector.load %arg2[%c0_3, %c0_4, %c0_5] : memref<3x128x128xf32, #tpu.memory_space<vmem>>, vector<1x128x128xf32>
    %6 = vector.shape_cast %5 : vector<1x128x128xf32> to vector<128x128xf32>
    %cst_6 = arith.constant dense<0.000000e+00> : vector<32x128xf32>
    %7 = tpu.matmul %4, %6, %cst_6 {dimension_numbers = #tpu.dot_dimension_numbers<[1], [0], [0], [1], [0, 0, 1, 1], [], []>} : vector<32x128xf32>, vector<128x128xf32>, vector<32x128xf32> -> vector<32x128xf32>
    %8 = arith.addf %1, %7 : vector<32x128xf32>
    %c0_7 = arith.constant 0 : index
    %c0_8 = arith.constant 0 : index
    %c0_9 = arith.constant 0 : index
    %9 = vector.load %arg3[%c0_7, %c0_8, %c0_9] : memref<3x128x128xf32, #tpu.memory_space<vmem>>, vector<1x128x128xf32>
    %10 = vector.shape_cast %9 : vector<1x128x128xf32> to vector<128x128xf32>
    %cst_10 = arith.constant dense<0.000000e+00> : vector<32x128xf32>
    %11 = tpu.matmul %4, %10, %cst_10 {dimension_numbers = #tpu.dot_dimension_numbers<[1], [0], [0], [1], [0, 0, 1, 1], [], []>} : vector<32x128xf32>, vector<128x128xf32>, vector<32x128xf32> -> vector<32x128xf32>
    %12 = arith.addf %2, %11 : vector<32x128xf32>
    %13 = vector.extract_strided_slice %0 {offsets = [0, 8, 0], sizes = [2, 16, 128], strides = [1, 1, 1]} : vector<2x25x128xf32> to vector<2x16x128xf32>
    %14 = vector.shape_cast %13 : vector<2x16x128xf32> to vector<32x128xf32>
    %c1 = arith.constant 1 : index
    %c0_11 = arith.constant 0 : index
    %c0_12 = arith.constant 0 : index
    %15 = vector.load %arg2[%c1, %c0_11, %c0_12] : memref<3x128x128xf32, #tpu.memory_space<vmem>>, vector<1x128x128xf32>
    %16 = vector.shape_cast %15 : vector<1x128x128xf32> to vector<128x128xf32>
    %cst_13 = arith.constant dense<0.000000e+00> : vector<32x128xf32>
    %17 = tpu.matmul %14, %16, %cst_13 {dimension_numbers = #tpu.dot_dimension_numbers<[1], [0], [0], [1], [0, 0, 1, 1], [], []>} : vector<32x128xf32>, vector<128x128xf32>, vector<32x128xf32> -> vector<32x128xf32>
    %18 = arith.addf %8, %17 : vector<32x128xf32>
    %c1_14 = arith.constant 1 : index
    %c0_15 = arith.constant 0 : index
    %c0_16 = arith.constant 0 : index
    %19 = vector.load %arg3[%c1_14, %c0_15, %c0_16] : memref<3x128x128xf32, #tpu.memory_space<vmem>>, vector<1x128x128xf32>
    %20 = vector.shape_cast %19 : vector<1x128x128xf32> to vector<128x128xf32>
    %cst_17 = arith.constant dense<0.000000e+00> : vector<32x128xf32>
    %21 = tpu.matmul %14, %20, %cst_17 {dimension_numbers = #tpu.dot_dimension_numbers<[1], [0], [0], [1], [0, 0, 1, 1], [], []>} : vector<32x128xf32>, vector<128x128xf32>, vector<32x128xf32> -> vector<32x128xf32>
    %22 = arith.addf %12, %21 : vector<32x128xf32>
    %23 = vector.extract_strided_slice %0 {offsets = [0, 9, 0], sizes = [2, 16, 128], strides = [1, 1, 1]} : vector<2x25x128xf32> to vector<2x16x128xf32>
    %24 = vector.shape_cast %23 : vector<2x16x128xf32> to vector<32x128xf32>
    %c2 = arith.constant 2 : index
    %c0_18 = arith.constant 0 : index
    %c0_19 = arith.constant 0 : index
    %25 = vector.load %arg2[%c2, %c0_18, %c0_19] : memref<3x128x128xf32, #tpu.memory_space<vmem>>, vector<1x128x128xf32>
    %26 = vector.shape_cast %25 : vector<1x128x128xf32> to vector<128x128xf32>
    %cst_20 = arith.constant dense<0.000000e+00> : vector<32x128xf32>
    %27 = tpu.matmul %24, %26, %cst_20 {dimension_numbers = #tpu.dot_dimension_numbers<[1], [0], [0], [1], [0, 0, 1, 1], [], []>} : vector<32x128xf32>, vector<128x128xf32>, vector<32x128xf32> -> vector<32x128xf32>
    %28 = arith.addf %18, %27 : vector<32x128xf32>
    %c2_21 = arith.constant 2 : index
    %c0_22 = arith.constant 0 : index
    %c0_23 = arith.constant 0 : index
    %29 = vector.load %arg3[%c2_21, %c0_22, %c0_23] : memref<3x128x128xf32, #tpu.memory_space<vmem>>, vector<1x128x128xf32>
    %30 = vector.shape_cast %29 : vector<1x128x128xf32> to vector<128x128xf32>
    %cst_24 = arith.constant dense<0.000000e+00> : vector<32x128xf32>
    %31 = tpu.matmul %24, %30, %cst_24 {dimension_numbers = #tpu.dot_dimension_numbers<[1], [0], [0], [1], [0, 0, 1, 1], [], []>} : vector<32x128xf32>, vector<128x128xf32>, vector<32x128xf32> -> vector<32x128xf32>
    %32 = arith.addf %22, %31 : vector<32x128xf32>
    %33 = vector.shape_cast %28 : vector<32x128xf32> to vector<2x16x128xf32>
    %c0_25 = arith.constant 0 : index
    %c8 = arith.constant 8 : index
    %c0_26 = arith.constant 0 : index
    %34 = vector.load %arg4[%c0_25, %c8, %c0_26] : memref<2x25x128xf32, #tpu.memory_space<vmem>>, vector<2x16x128xf32>
    tpu.vector_store %arg4[%c0_25, %c8, %c0_26], %33 {strides = array<i32>} : memref<2x25x128xf32, #tpu.memory_space<vmem>>, vector<2x16x128xf32>,
    %cst_27 = arith.constant dense<0.000000e+00> : vector<128xf32>
    %35 = vector.multi_reduction <add>, %28, %cst_27 [0] : vector<32x128xf32> to vector<128xf32>
    %36 = vector.shape_cast %35 : vector<128xf32> to vector<1x128xf32>
    %37 = arith.mulf %28, %28 : vector<32x128xf32>
    %cst_28 = arith.constant dense<0.000000e+00> : vector<128xf32>
    %38 = vector.multi_reduction <add>, %37, %cst_28 [0] : vector<32x128xf32> to vector<128xf32>
    %39 = vector.shape_cast %38 : vector<128xf32> to vector<1x128xf32>
    %40 = tpu.concatenate %36, %39 in 0 : vector<1x128xf32>, vector<1x128xf32> -> vector<2x128xf32>
    %41 = vector.shape_cast %40 : vector<2x128xf32> to vector<1x2x128xf32>
    %c0_29 = arith.constant 0 : index
    %c0_30 = arith.constant 0 : index
    %c0_31 = arith.constant 0 : index
    %42 = vector.load %arg5[%c0_29, %c0_30, %c0_31] : memref<1x2x128xf32, #tpu.memory_space<vmem>>, vector<1x2x128xf32>
    tpu.vector_store %arg5[%c0_29, %c0_30, %c0_31], %41 {strides = array<i32>} : memref<1x2x128xf32, #tpu.memory_space<vmem>>, vector<1x2x128xf32>,
    %43 = vector.shape_cast %32 : vector<32x128xf32> to vector<2x16x128xf32>
    %c0_32 = arith.constant 0 : index
    %c0_33 = arith.constant 0 : index
    %c0_34 = arith.constant 0 : index
    %44 = vector.load %arg6[%c0_32, %c0_33, %c0_34] : memref<2x16x128xf32, #tpu.memory_space<vmem>>, vector<2x16x128xf32>
    tpu.vector_store %arg6[%c0_32, %c0_33, %c0_34], %43 {strides = array<i32>} : memref<2x16x128xf32, #tpu.memory_space<vmem>>, vector<2x16x128xf32>,
    return
  }
  func.func @transform_0(%arg0: i32) -> (i32, i32, i32) {
    %c0_i32 = arith.constant 0 : i32
    %c0_i32_0 = arith.constant 0 : i32
    %c0_i32_1 = arith.constant 0 : i32
    return %arg0, %c0_i32, %c0_i32_0 : i32, i32, i32
  }
  func.func @transform_1(%arg0: i32) -> (i32, i32, i32) {
    %c0_i32 = arith.constant 0 : i32
    %c0_i32_0 = arith.constant 0 : i32
    %c0_i32_1 = arith.constant 0 : i32
    %c0_i32_2 = arith.constant 0 : i32
    return %c0_i32, %c0_i32_0, %c0_i32_1 : i32, i32, i32
  }
  func.func @transform_2(%arg0: i32) -> (i32, i32, i32) {
    %c0_i32 = arith.constant 0 : i32
    %c0_i32_0 = arith.constant 0 : i32
    %c0_i32_1 = arith.constant 0 : i32
    %c0_i32_2 = arith.constant 0 : i32
    return %c0_i32, %c0_i32_0, %c0_i32_1 : i32, i32, i32
  }
  func.func @transform_3(%arg0: i32) -> (i32, i32, i32) {
    %c0_i32 = arith.constant 0 : i32
    %c0_i32_0 = arith.constant 0 : i32
    %c0_i32_1 = arith.constant 0 : i32
    return %arg0, %c0_i32, %c0_i32_0 : i32, i32, i32
  }
  func.func @transform_4(%arg0: i32) -> (i32, i32, i32) {
    %c0_i32 = arith.constant 0 : i32
    %c0_i32_0 = arith.constant 0 : i32
    %c0_i32_1 = arith.constant 0 : i32
    return %arg0, %c0_i32, %c0_i32_0 : i32, i32, i32
  }
  func.func @transform_5(%arg0: i32) -> (i32, i32, i32) {
    %c0_i32 = arith.constant 0 : i32
    %c0_i32_0 = arith.constant 0 : i32
    %c0_i32_1 = arith.constant 0 : i32
    return %arg0, %c0_i32, %c0_i32_0 : i32, i32, i32
  }
}

</mosaic_0001>

<bundles_post_ra>
// kernel: tpu_custom_call.1
= control target key start
LH: loop header
LB: loop body
LE: loop exit
PB: predicated region body
PF: predicated region fallthrough
CT: control target
= control target key end

     0   :  { %11 = vsyncpa [#allocation3], 0  ;;  %s1371_s0 = inlined_call_operand.vmem [shape: f32[2,25,128], index: 0, kind: input, shape index: {}]   ;;  %s1372_s1 = inlined_call_operand.hbm [shape: f32[3,128,128], index: 1, kind: input, shape index: {}]   ;;  %s1373_s2 = inlined_call_operand.hbm [shape: f32[3,128,128], index: 2, kind: input, shape index: {}]   ;;  %s1374_s3 = inlined_call_operand.vmem [shape: f32[2,25,128], index: 3, kind: output, shape index: {0}]   ;;  %s1375_s4 = inlined_call_operand.hbm [shape: f32[1,2,128], index: 4, kind: output, shape index: {1}]   ;;  %s1376_s5 = inlined_call_operand.hbm [shape: f32[2,16,128], index: 5, kind: output, shape index: {2}]  }
   0x1   :  { %12 = vsyncpa [#allocation6], 0 }
   0x2   :  { %13 = vsyncpa [#allocation4], 0 }
   0x3   :  { %14 = vsyncpa [#allocation9], 0  ;;  %s1221_s18 = smov [#allocation2]  }
   0x4   :  { %s22_s19 = sshll.u32 %s1221_s18, 4  ;;  %s23_s19 = int_to_ptr.vmem [resolvable:$true] %s22_s19 }
   0x5   :  { %s1141_s20 = scalar_lea.vmem %s23_s19, 6144  ;;  %p1146_p1 = scmp.lt.s32.totalorder %s23_s19, %s23_s19 }
   0x6   :  { %p1142_p0 = scmp.ne.s32.totalorder %s23_s19, %s1141_s20  ;;  %p1147_p2 = scmp.lt.s32.totalorder %s1141_s20, %s1141_s20 }
   0x8   :  { %p1148_p3 = por %p1147_p2, %p1146_p1 }
   0xa   :  { %p1149_p4 = pnand %p1148_p3, %p1142_p0 }
   0xc   :  { %1152 = shalt.err (!%p1149_p4)
}
   0xd   :  { %s1222_s21 = smov 128   ;;  %s1223_s22 = smov 8  }
   0xe   :  { %28 = dma.hbm_to_vmem [thread:$0]  %s1372_s1, 6144, %s23_s19, [#allocation3], %s1222_s21, %s1222_s21, %s1223_s22  }
   0xf   :  { %s1224_s25 = smov [#allocation5]  }
  0x10   :  { %s34_s26 = sshll.u32 %s1224_s25, 4  ;;  %s35_s26 = int_to_ptr.vmem [resolvable:$true] %s34_s26 }
  0x11   :  { %s1161_s27 = scalar_lea.vmem %s35_s26, 6144  ;;  %p1166_p6 = scmp.lt.s32.totalorder %s35_s26, %s35_s26 }
  0x12   :  { %p1162_p5 = scmp.ne.s32.totalorder %s35_s26, %s1161_s27  ;;  %p1167_p7 = scmp.lt.s32.totalorder %s1161_s27, %s1161_s27 }
  0x14   :  { %p1168_p8 = por %p1167_p7, %p1166_p6 }
  0x16   :  { %p1169_p9 = pnand %p1168_p8, %p1162_p5 }
  0x18   :  { %1172 = shalt.err (!%p1169_p9)
}
  0x19   :  { %40 = dma.hbm_to_vmem [thread:$0]  %s1373_s2, 6144, %s35_s26, [#allocation6], %s1222_s21, %s1222_s21, %s1223_s22  }
  0x1a   :  { %1213 = dma.done.wait [#allocation3], 6144  }
  0x1b   :  { %1214 = vsyncadd [#allocation3], 4294961152 }
  0x1c   :  { %1215 = dma.done.wait [#allocation6], 6144  }
  0x1d   :  { %1216 = vsyncadd [#allocation6], 4294961152  ;;  %v124_v0 = vld [vmem:[#allocation2 + $0xf8] sm:$0xff]  ;;  %v123_v2 = vld [vmem:[#allocation2 + $0xf0] sm:$0xff]  ;;  %vm484_vm0 = vcmask 1046528   ;;  %vm61_vm1 = vcmask 1040384  }
  0x1e   :  { %v91_v1 = vld [vmem:[#allocation2 + $0x78] sm:$0xff]  ;;  %899 = vmatprep.subr.mxu0 %v124_v0  ;;  %v90_v3 = vld [vmem:[#allocation2 + $0x70] sm:$0xff]  ;;  %v122_v4 = vld [vmem:[#allocation2 + $0xe8] sm:$0xff]  ;;  %s1225_s20 = smov [#allocation8]  }
  0x1f   :  { %937 = vmatprep.subr.mxu1 %v91_v1  ;;  %900 = vmatpush3.msra.mxu0 %v124_v0  ;;  %v89_v5 = vld [vmem:[#allocation2 + $0x68] sm:$0xff]  ;;  %v121_v6 = vld [vmem:[#allocation2 + $0xe0] sm:$0xff]  ;;  %v120_v8 = vld [vmem:[#allocation2 + $0xd8] sm:$0xff]  ;;  %s760_s23 = sshll.u32 %s1225_s20, 4  ;;  %s761_s23 = int_to_ptr.vmem [resolvable:$true] %s760_s23 }
  0x20   :  { %938 = vmatpush3.msra.mxu1 %v91_v1  ;;  %901 = vmatprep.subr.mxu0 %v123_v2  ;;  %v88_v7 = vld [vmem:[#allocation2 + $0x60] sm:$0xff]  ;;  %v87_v9 = vld [vmem:[#allocation2 + $0x58] sm:$0xff]  ;;  %v119_v10 = vld [vmem:[#allocation2 + $0xd0] sm:$0xff]  ;;  %s1173_s1 = scalar_lea.vmem %s761_s23, 512  ;;  %p1178_p11 = scmp.lt.s32.totalorder %s761_s23, %s761_s23 }
  0x21   :  { %939 = vmatprep.subr.mxu1 %v90_v3  ;;  %902 = vmatpush3.msra.mxu0 %v123_v2  ;;  %v86_v11 = vld [vmem:[#allocation2 + $0x50] sm:$0xff]  ;;  %v118_v12 = vld [vmem:[#allocation2 + $0xc8] sm:$0xff]  ;;  %v117_v17 = vld [vmem:[#allocation2 + $0xc0] sm:$0xff]  ;;  %p1174_p10 = scmp.ne.s32.totalorder %s761_s23, %s1173_s1  ;;  %p1179_p12 = scmp.lt.s32.totalorder %s1173_s1, %s1173_s1 }
  0x22   :  { %940 = vmatpush3.msra.mxu1 %v90_v3  ;;  %903 = vmatprep.subr.mxu0 %v122_v4  ;;  %v85_v13 = vld [vmem:[#allocation2 + $0x48] sm:$0xff]  ;;  %v1277_v15 = vld [vmem:[%s1371_s0 + $0x10] sm:$0xff]  ;;  %v84_v18 = vld [vmem:[#allocation2 + $0x40] sm:$0xff] }
  0x23   :  { %941 = vmatprep.subr.mxu1 %v89_v5  ;;  %904 = vmatpush3.msra.mxu0 %v122_v4  ;;  %v1272_v14 = vld [vmem:[%s1371_s0 + $0x8] sm:$0xff]  ;;  %v486_v19 = vrot.slane %v1277_v15, 1  ;;  %v116_v20 = vld [vmem:[#allocation2 + $0xb8] sm:$0xff]  ;;  %v115_v23 = vld [vmem:[#allocation2 + $0xb0] sm:$0xff]  ;;  %v65_v38 = vrot.slane %v1277_v15, 7  ;;  %p1180_p13 = por %p1179_p12, %p1178_p11 }
  0x24   :  { %942 = vmatpush3.msra.mxu1 %v89_v5  ;;  %905 = vmatprep.subr.mxu0 %v121_v6  ;;  %v485_v16 = vrot.slane %v1272_v14, 1  ;;  %v83_v21 = vld [vmem:[#allocation2 + $0x38] sm:$0xff]  ;;  %v82_v24 = vld [vmem:[#allocation2 + $0x30] sm:$0xff]  ;;  %v114_v25 = vld [vmem:[#allocation2 + $0xa8] sm:$0xff]  ;;  %v63_v37 = vrot.slane %v1272_v14, 7 }
  0x25   :  { %943 = vmatprep.subr.mxu1 %v88_v7  ;;  %906 = vmatpush3.msra.mxu0 %v121_v6  ;;  %v81_v26 = vld [vmem:[#allocation2 + $0x28] sm:$0xff]  ;;  %v113_v27 = vld [vmem:[#allocation2 + $0xa0] sm:$0xff]  ;;  %v112_v29 = vld [vmem:[#allocation2 + $0x98] sm:$0xff]  ;;  %p1181_p0 = pnand %p1180_p13, %p1174_p10 }
  0x26   :  { %944 = vmatpush3.msra.mxu1 %v88_v7  ;;  %907 = vmatprep.subr.mxu0 %v120_v8  ;;  %v1284_v22 = vsel %vm484_vm0, %v485_v16, %v486_v19  ;;  %v80_v28 = vld [vmem:[#allocation2 + $0x20] sm:$0xff]  ;;  %v79_v30 = vld [vmem:[#allocation2 + $0x18] sm:$0xff]  ;;  %v111_v32 = vld [vmem:[#allocation2 + $0x90] sm:$0xff]  ;;  %v1295_v42 = vsel %vm61_vm1, %v63_v37, %v65_v38 }
  0x27   :  { %945 = vmatprep.subr.mxu1 %v87_v9  ;;  %908 = vmatpush3.msra.mxu0 %v120_v8  ;;  %v47_v31 = vld [vmem:[%s1371_s0] sm:$0xff]  ;;  %v78_v33 = vld [vmem:[#allocation2 + $0x10] sm:$0xff]  ;;  %v110_v34 = vld [vmem:[#allocation2 + $0x88] sm:$0xff] }
  0x28   :  { %946 = vmatpush3.msra.mxu1 %v87_v9  ;;  %909 = vmatprep.subr.mxu0 %v119_v10  ;;  %v77_v35 = vld [vmem:[#allocation2 + $0x8] sm:$0xff]  ;;  %v62_v36 = vrot.slane %v47_v31, 7  ;;  %v109_v39 = vld [vmem:[#allocation2 + $0x80] sm:$0xff]  ;;  %v311_v43 = vld [vmem:[#allocation5 + $0xf8] sm:$0xff] }
  0x29   :  { %947 = vmatprep.subr.mxu1 %v86_v11  ;;  %910 = vmatpush3.msra.mxu0 %v119_v10  ;;  %v76_v40 = vld [vmem:[#allocation2] sm:$0xff]  ;;  %v107_v44 = vld [vmem:[#allocation5 + $0x78] sm:$0xff]  ;;  %v310_v45 = vld [vmem:[#allocation5 + $0xf0] sm:$0xff] }
  0x2a   :  { %948 = vmatpush3.msra.mxu1 %v86_v11  ;;  %911 = vmatprep.subr.mxu0 %v118_v12  ;;  %v1292_v41 = vsel %vm61_vm1, %v62_v36, %v63_v37  ;;  %v106_v46 = vld [vmem:[#allocation5 + $0x70] sm:$0xff]  ;;  %v309_v47 = vld [vmem:[#allocation5 + $0xe8] sm:$0xff]  ;;  %v308_v49 = vld [vmem:[#allocation5 + $0xe0] sm:$0xff] }
  0x2b   :  { %949 = vmatprep.subr.mxu1 %v85_v13  ;;  %912 = vmatpush3.msra.mxu0 %v118_v12  ;;  %v105_v48 = vld [vmem:[#allocation5 + $0x68] sm:$0xff]  ;;  %v104_v50 = vld [vmem:[#allocation5 + $0x60] sm:$0xff]  ;;  %v307_v51 = vld [vmem:[#allocation5 + $0xd8] sm:$0xff] }
  0x2c   :  { %950 = vmatpush3.msra.mxu1 %v85_v13  ;;  %913 = vmatprep.subr.mxu0 %v117_v17  ;;  %v103_v52 = vld [vmem:[#allocation5 + $0x58] sm:$0xff]  ;;  %v306_v53 = vld [vmem:[#allocation5 + $0xd0] sm:$0xff]  ;;  %v305_v55 = vld [vmem:[#allocation5 + $0xc8] sm:$0xff] }
  0x2d   :  { %951 = vmatprep.subr.mxu1 %v84_v18  ;;  %914 = vmatpush3.msra.mxu0 %v117_v17  ;;  %v102_v54 = vld [vmem:[#allocation5 + $0x50] sm:$0xff]  ;;  %v101_v56 = vld [vmem:[#allocation5 + $0x48] sm:$0xff]  ;;  %v304_v57 = vld [vmem:[#allocation5 + $0xc0] sm:$0xff] }
  0x2e   :  { %952 = vmatpush3.msra.mxu1 %v84_v18  ;;  %915 = vmatprep.subr.mxu0 %v116_v20  ;;  %v100_v58 = vld [vmem:[#allocation5 + $0x40] sm:$0xff]  ;;  %v303_v59 = vld [vmem:[#allocation5 + $0xb8] sm:$0xff]  ;;  %v302_v61 = vld [vmem:[#allocation5 + $0xb0] sm:$0xff] }
  0x2f   :  { %953 = vmatprep.subr.mxu1 %v83_v21  ;;  %916 = vmatpush3.msra.mxu0 %v116_v20  ;;  %v99_v60 = vld [vmem:[#allocation5 + $0x38] sm:$0xff]  ;;  %v98_v62 = vld [vmem:[#allocation5 + $0x30] sm:$0xff]  ;;  %v1304_v63 = vld [vmem:[%s1371_s0 + $0x28] sm:$0xff] }
  0x30   :  { %954 = vmatpush3.msra.mxu1 %v83_v21  ;;  %917 = vmatprep.subr.mxu0 %v115_v23  ;;  %v51_v0 = vld [vmem:[%s1371_s0 + $0x20] sm:$0xff]  ;;  %v301_v1 = vld [vmem:[#allocation5 + $0xa8] sm:$0xff]  ;;  %v1312_v3 = vld [vmem:[%s1371_s0 + $0x30] sm:$0xff]  ;;  %v68_v7 = vrot.slane %v1304_v63, 7 }
  0x31   :  { %955 = vmatprep.subr.mxu1 %v82_v24  ;;  %918 = vmatpush3.msra.mxu0 %v115_v23  ;;  %v97_v2 = vld [vmem:[#allocation5 + $0x28] sm:$0xff]  ;;  %v300_v4 = vld [vmem:[#allocation5 + $0xa0] sm:$0xff]  ;;  %v67_v6 = vrot.slane %v51_v0, 7  ;;  %v299_v8 = vld [vmem:[#allocation5 + $0x98] sm:$0xff]  ;;  %v70_v10 = vrot.slane %v1312_v3, 7 }
  0x32   :  { %956 = vmatpush3.msra.mxu1 %v82_v24  ;;  %919 = vmatprep.subr.mxu0 %v114_v25  ;;  %v96_v5 = vld [vmem:[#allocation5 + $0x20] sm:$0xff]  ;;  %v95_v9 = vld [vmem:[#allocation5 + $0x18] sm:$0xff]  ;;  %v298_v12 = vld [vmem:[#allocation5 + $0x90] sm:$0xff] }
  0x33   :  { %957 = vmatprep.subr.mxu1 %v81_v26  ;;  %920 = vmatpush3.msra.mxu0 %v114_v25  ;;  %v1317_v11 = vsel %vm61_vm1, %v67_v6, %v68_v7  ;;  %v94_v13 = vld [vmem:[#allocation5 + $0x10] sm:$0xff]  ;;  %v1320_v16 = vsel %vm61_vm1, %v68_v7, %v70_v10  ;;  %v297_v17 = vld [vmem:[#allocation5 + $0x88] sm:$0xff]  ;;  %v296_v20 = vld [vmem:[#allocation5 + $0x80] sm:$0xff] }
  0x34   :  { %958 = vmatpush3.msra.mxu1 %v81_v26  ;;  %921 = vmatprep.subr.mxu0 %v113_v27  ;;  %v93_v18 = vld [vmem:[#allocation5 + $0x8] sm:$0xff]  ;;  %v92_v21 = vld [vmem:[#allocation5] sm:$0xff]  ;;  %v515_v23 = vld [vmem:[#allocation2 + $0x178] sm:$0xff] }
  0x35   :  { %959 = vmatprep.subr.mxu1 %v80_v28  ;;  %922 = vmatpush3.msra.mxu0 %v113_v27  ;;  %v621_v24 = vld [vmem:[#allocation5 + $0x178] sm:$0xff]  ;;  %v514_v25 = vld [vmem:[#allocation2 + $0x170] sm:$0xff]  ;;  %v513_v27 = vld [vmem:[#allocation2 + $0x168] sm:$0xff] }
  0x36   :  { %960 = vmatpush3.msra.mxu1 %v80_v28  ;;  %923 = vmatprep.subr.mxu0 %v112_v29  ;;  %v620_v26 = vld [vmem:[#allocation5 + $0x170] sm:$0xff]  ;;  %v619_v28 = vld [vmem:[#allocation5 + $0x168] sm:$0xff]  ;;  %v617_v31 = vld [vmem:[#allocation5 + $0x158] sm:$0xff] }
  0x37   :  { %961 = vmatprep.subr.mxu1 %v79_v30  ;;  %924 = vmatpush3.msra.mxu0 %v112_v29  ;;  %v618_v29 = vld [vmem:[#allocation5 + $0x160] sm:$0xff]  ;;  %v507_v38 = vld [vmem:[#allocation2 + $0x138] sm:$0xff] }
  0x38   :  { %962 = vmatpush3.msra.mxu1 %v79_v30  ;;  %925 = vmatprep.subr.mxu0 %v111_v32  ;;  %v511_v30 = vld [vmem:[#allocation2 + $0x158] sm:$0xff]  ;;  %v508_v36 = vld [vmem:[#allocation2 + $0x140] sm:$0xff] }
  0x39   :  { %963 = vmatprep.subr.mxu1 %v78_v33  ;;  %926 = vmatpush3.msra.mxu0 %v111_v32  ;;  %v510_v32 = vld [vmem:[#allocation2 + $0x150] sm:$0xff]  ;;  %v614_v37 = vld [vmem:[#allocation5 + $0x140] sm:$0xff] }
  0x3a   :  { %964 = vmatpush3.msra.mxu1 %v78_v33  ;;  %927 = vmatprep.subr.mxu0 %v110_v34  ;;  %v616_v33 = vld [vmem:[#allocation5 + $0x150] sm:$0xff] }
  0x3b   :  { %965 = vmatprep.subr.mxu1 %v77_v35  ;;  %928 = vmatpush3.msra.mxu0 %v110_v34  ;;  %v509_v34 = vld [vmem:[#allocation2 + $0x148] sm:$0xff] }
  0x3c   :  { %966 = vmatpush3.msra.mxu1 %v77_v35  ;;  %929 = vmatprep.subr.mxu0 %v109_v39  ;;  %v615_v35 = vld [vmem:[#allocation5 + $0x148] sm:$0xff] }
  0x3d   :  { %967 = vmatprep.subr.mxu1 %v76_v40  ;;  %930 = vmatpush3.msra.mxu0 %v109_v39  ;;  %v613_v39 = vld [vmem:[#allocation5 + $0x138] sm:$0xff] }
  0x3e   :  { %931 = vmatprep.mubr.f32.mxu0 %v1272_v14  ;;  %968 = vmatpush3.msra.mxu1 %v76_v40  ;;  %v506_v40 = vld [vmem:[#allocation2 + $0x130] sm:$0xff] }
  0x3f   :  { %969 = vmatprep.mubr.f32.mxu1 %v1292_v41  ;;  %932 = vmatmul.mubr.f32.vlgmr.msra.gmra.mxu0 %v1277_v15 }
  0x40   :  { %970 = vmatmul.mubr.f32.vlgmr.msra.gmra.mxu1 %v1295_v42  ;;  %975 = vmatprep.subr.mxu0 %v311_v43 }
  0x41   :  { %1013 = vmatprep.subr.mxu1 %v107_v44  ;;  %976 = vmatpush3.msra.mxu0 %v311_v43  ;;  %v611_v43 = vld [vmem:[#allocation5 + $0x128] sm:$0xff] }
  0x42   :  { %1014 = vmatpush3.msra.mxu1 %v107_v44  ;;  %977 = vmatprep.subr.mxu0 %v310_v45  ;;  %v504_v44 = vld [vmem:[#allocation2 + $0x120] sm:$0xff] }
  0x43   :  { %1015 = vmatprep.subr.mxu1 %v106_v46  ;;  %978 = vmatpush3.msra.mxu0 %v310_v45  ;;  %v610_v45 = vld [vmem:[#allocation5 + $0x120] sm:$0xff] }
  0x44   :  { %1016 = vmatpush3.msra.mxu1 %v106_v46  ;;  %979 = vmatprep.subr.mxu0 %v309_v47  ;;  %v503_v46 = vld [vmem:[#allocation2 + $0x118] sm:$0xff] }
  0x45   :  { %1017 = vmatprep.subr.mxu1 %v105_v48  ;;  %980 = vmatpush3.msra.mxu0 %v309_v47  ;;  %v609_v47 = vld [vmem:[#allocation5 + $0x118] sm:$0xff] }
  0x46   :  { %1018 = vmatpush3.msra.mxu1 %v105_v48  ;;  %981 = vmatprep.subr.mxu0 %v308_v49  ;;  %v502_v48 = vld [vmem:[#allocation2 + $0x110] sm:$0xff] }
  0x47   :  { %1019 = vmatprep.subr.mxu1 %v104_v50  ;;  %982 = vmatpush3.msra.mxu0 %v308_v49  ;;  %v608_v49 = vld [vmem:[#allocation5 + $0x110] sm:$0xff] }
  0x48   :  { %1020 = vmatpush3.msra.mxu1 %v104_v50  ;;  %983 = vmatprep.subr.mxu0 %v307_v51  ;;  %v50_v50 = vld [vmem:[%s1371_s0 + $0x18] sm:$0x1] }
  0x49   :  { %1021 = vmatprep.subr.mxu1 %v103_v52  ;;  %984 = vmatpush3.msra.mxu0 %v307_v51  ;;  %v501_v51 = vld [vmem:[#allocation2 + $0x108] sm:$0xff] }
  0x4a   :  { %1022 = vmatpush3.msra.mxu1 %v103_v52  ;;  %985 = vmatprep.subr.mxu0 %v306_v53  ;;  %v607_v52 = vld [vmem:[#allocation5 + $0x108] sm:$0xff] }
  0x4b   :  { %1023 = vmatprep.subr.mxu1 %v102_v54  ;;  %986 = vmatpush3.msra.mxu0 %v306_v53  ;;  %v488_v53 = vrot.slane %v50_v50, 1 }
  0x4c   :  { %1024 = vmatpush3.msra.mxu1 %v102_v54  ;;  %987 = vmatprep.subr.mxu0 %v305_v55  ;;  %v500_v54 = vld [vmem:[#allocation2 + $0x100] sm:$0xff] }
  0x4d   :  { %1025 = vmatprep.subr.mxu1 %v101_v56  ;;  %988 = vmatpush3.msra.mxu0 %v305_v55  ;;  %v606_v55 = vld [vmem:[#allocation5 + $0x100] sm:$0xff] }
  0x4e   :  { %1026 = vmatpush3.msra.mxu1 %v101_v56  ;;  %989 = vmatprep.subr.mxu0 %v304_v57  ;;  %v490_v56 = vrot.slane %v1304_v63, 1 }
  0x4f   :  { %1027 = vmatprep.subr.mxu1 %v100_v58  ;;  %990 = vmatpush3.msra.mxu0 %v304_v57  ;;  %v491_v57 = vrot.slane %v1312_v3, 1 }
  0x50   :  { %1028 = vmatpush3.msra.mxu1 %v100_v58  ;;  %991 = vmatprep.subr.mxu0 %v303_v59  ;;  %v54_v58 = vld [vmem:[%s1371_s0 + $0x38] sm:$0x1] }
  0x51   :  { %1029 = vmatprep.subr.mxu1 %v99_v60  ;;  %992 = vmatpush3.msra.mxu0 %v303_v59  ;;  %v489_v59 = vsel %vm484_vm0, %v486_v19, %v488_v53 }
  0x52   :  { %1030 = vmatpush3.msra.mxu1 %v99_v60  ;;  %993 = vmatprep.subr.mxu0 %v302_v61  ;;  %v493_v60 = vrot.slane %v54_v58, 1 }
  0x53   :  { %1031 = vmatprep.subr.mxu1 %v98_v62  ;;  %994 = vmatpush3.msra.mxu0 %v302_v61  ;;  %v492_v61 = vsel %vm484_vm0, %v490_v56, %v491_v57 }
  0x54   :  { %1032 = vmatpush3.msra.mxu1 %v98_v62  ;;  %995 = vmatprep.subr.mxu0 %v301_v1  ;;  %v494_v62 = vsel %vm484_vm0, %v491_v57, %v493_v60 }
  0x55   :  { %1033 = vmatprep.subr.mxu1 %v97_v2  ;;  %996 = vmatpush3.msra.mxu0 %v301_v1 }
  0x56   :  { %1034 = vmatpush3.msra.mxu1 %v97_v2  ;;  %997 = vmatprep.subr.mxu0 %v300_v4 }
  0x57   :  { %1035 = vmatprep.subr.mxu1 %v96_v5  ;;  %998 = vmatpush3.msra.mxu0 %v300_v4 }
  0x58   :  { %1036 = vmatpush3.msra.mxu1 %v96_v5  ;;  %999 = vmatprep.subr.mxu0 %v299_v8 }
  0x59   :  { %1037 = vmatprep.subr.mxu1 %v95_v9  ;;  %1000 = vmatpush3.msra.mxu0 %v299_v8 }
  0x5a   :  { %1038 = vmatpush3.msra.mxu1 %v95_v9  ;;  %934 = vmatprep.mubr.f32.mxu0 %v1304_v63 }
  0x5b   :  { %972 = vmatprep.mubr.f32.mxu1 %v1317_v11  ;;  %1001 = vmatprep.subr.mxu0 %v298_v12 }
  0x5c   :  { %1039 = vmatprep.subr.mxu1 %v94_v13  ;;  %935 = vmatmul.mubr.f32.gmra.mxu0 %v1312_v3 }
  0x5d   :  { %973 = vmatmul.mubr.f32.gmra.mxu1 %v1320_v16  ;;  %1002 = vmatpush3.msra.mxu0 %v298_v12 }
  0x5e   :  { %1040 = vmatpush3.msra.mxu1 %v94_v13  ;;  %1003 = vmatprep.subr.mxu0 %v297_v17 }
  0x5f   :  { %1041 = vmatprep.subr.mxu1 %v93_v18  ;;  %1004 = vmatpush3.msra.mxu0 %v297_v17 }
  0x60   :  { %1042 = vmatpush3.msra.mxu1 %v93_v18  ;;  %1005 = vmatprep.subr.mxu0 %v296_v20 }
  0x61   :  { %1043 = vmatprep.subr.mxu1 %v92_v21  ;;  %1006 = vmatpush3.msra.mxu0 %v296_v20 }
  0x62   :  { %1007 = vmatprep.mubr.f32.mxu0 %v1272_v14  ;;  %1044 = vmatpush3.msra.mxu1 %v92_v21  ;;  %v512_v14 = vld [vmem:[#allocation2 + $0x160] sm:$0xff] }
  0x63   :  { %1045 = vmatprep.mubr.f32.mxu1 %v1292_v41  ;;  %1008 = vmatmul.mubr.f32.vlgmr.msra.gmra.mxu0 %v1277_v15  ;;  %v612_v41 = vld [vmem:[#allocation5 + $0x130] sm:$0xff] }
  0x64   :  { %1046 = vmatmul.mubr.f32.vlgmr.msra.gmra.mxu1 %v1295_v42  ;;  %1051 = vmatprep.subr.mxu0 %v515_v23  ;;  %v505_v42 = vld [vmem:[#allocation2 + $0x128] sm:$0xff] }
  0x65   :  { %1089 = vmatprep.subr.mxu1 %v621_v24  ;;  %1052 = vmatpush3.msra.mxu0 %v515_v23 }
  0x66   :  { %1090 = vmatpush3.msra.mxu1 %v621_v24  ;;  %1053 = vmatprep.subr.mxu0 %v514_v25 }
  0x67   :  { %1091 = vmatprep.subr.mxu1 %v620_v26  ;;  %1054 = vmatpush3.msra.mxu0 %v514_v25 }
  0x68   :  { %1092 = vmatpush3.msra.mxu1 %v620_v26  ;;  %1055 = vmatprep.subr.mxu0 %v513_v27 }
  0x69   :  { %1093 = vmatprep.subr.mxu1 %v619_v28  ;;  %1056 = vmatpush3.msra.mxu0 %v513_v27 }
  0x6a   :  { %1094 = vmatpush3.msra.mxu1 %v619_v28  ;;  %1057 = vmatprep.subr.mxu0 %v512_v14 }
  0x6b   :  { %1095 = vmatprep.subr.mxu1 %v618_v29  ;;  %1058 = vmatpush3.msra.mxu0 %v512_v14 }
  0x6c   :  { %1096 = vmatpush3.msra.mxu1 %v618_v29  ;;  %1059 = vmatprep.subr.mxu0 %v511_v30 }
  0x6d   :  { %1097 = vmatprep.subr.mxu1 %v617_v31  ;;  %1060 = vmatpush3.msra.mxu0 %v511_v30 }
  0x6e   :  { %1098 = vmatpush3.msra.mxu1 %v617_v31  ;;  %1061 = vmatprep.subr.mxu0 %v510_v32 }
  0x6f   :  { %1099 = vmatprep.subr.mxu1 %v616_v33  ;;  %1062 = vmatpush3.msra.mxu0 %v510_v32 }
  0x70   :  { %1100 = vmatpush3.msra.mxu1 %v616_v33  ;;  %1063 = vmatprep.subr.mxu0 %v509_v34 }
  0x71   :  { %1101 = vmatprep.subr.mxu1 %v615_v35  ;;  %1064 = vmatpush3.msra.mxu0 %v509_v34 }
  0x72   :  { %1102 = vmatpush3.msra.mxu1 %v615_v35  ;;  %1065 = vmatprep.subr.mxu0 %v508_v36 }
  0x73   :  { %1103 = vmatprep.subr.mxu1 %v614_v37  ;;  %1066 = vmatpush3.msra.mxu0 %v508_v36 }
  0x74   :  { %1104 = vmatpush3.msra.mxu1 %v614_v37  ;;  %1067 = vmatprep.subr.mxu0 %v507_v38 }
  0x75   :  { %1105 = vmatprep.subr.mxu1 %v613_v39  ;;  %1068 = vmatpush3.msra.mxu0 %v507_v38 }
  0x76   :  { %1106 = vmatpush3.msra.mxu1 %v613_v39  ;;  %1069 = vmatprep.subr.mxu0 %v506_v40 }
  0x77   :  { %1107 = vmatprep.subr.mxu1 %v612_v41  ;;  %1070 = vmatpush3.msra.mxu0 %v506_v40 }
  0x78   :  { %1108 = vmatpush3.msra.mxu1 %v612_v41  ;;  %1071 = vmatprep.subr.mxu0 %v505_v42 }
  0x79   :  { %1109 = vmatprep.subr.mxu1 %v611_v43  ;;  %1072 = vmatpush3.msra.mxu0 %v505_v42 }
  0x7a   :  { %1110 = vmatpush3.msra.mxu1 %v611_v43  ;;  %1073 = vmatprep.subr.mxu0 %v504_v44 }
  0x7b   :  { %1111 = vmatprep.subr.mxu1 %v610_v45  ;;  %1074 = vmatpush3.msra.mxu0 %v504_v44 }
  0x7c   :  { %1112 = vmatpush3.msra.mxu1 %v610_v45  ;;  %1075 = vmatprep.subr.mxu0 %v503_v46 }
  0x7d   :  { %1113 = vmatprep.subr.mxu1 %v609_v47  ;;  %1010 = vmatprep.mubr.f32.mxu0 %v1304_v63 }
  0x7e   :  { %1048 = vmatprep.mubr.f32.mxu1 %v1317_v11  ;;  %1076 = vmatpush3.msra.mxu0 %v503_v46 }
  0x7f   :  { %1114 = vmatpush3.msra.mxu1 %v609_v47  ;;  %1011 = vmatmul.mubr.f32.gmra.mxu0 %v1312_v3 }
  0x80   :  { %1049 = vmatmul.mubr.f32.gmra.mxu1 %v1320_v16  ;;  %1077 = vmatprep.subr.mxu0 %v502_v48 }
  0x81   :  { %1115 = vmatprep.subr.mxu1 %v608_v49  ;;  %1078 = vmatpush3.msra.mxu0 %v502_v48 }
  0x82   :  { %1116 = vmatpush3.msra.mxu1 %v608_v49  ;;  %1079 = vmatprep.subr.mxu0 %v501_v51 }
  0x83   :  { %1117 = vmatprep.subr.mxu1 %v607_v52  ;;  %1080 = vmatpush3.msra.mxu0 %v501_v51 }
  0x84   :  { %1118 = vmatpush3.msra.mxu1 %v607_v52  ;;  %1081 = vmatprep.subr.mxu0 %v500_v54 }
  0x85   :  { %1119 = vmatprep.subr.mxu1 %v606_v55  ;;  %1082 = vmatpush3.msra.mxu0 %v500_v54 }
  0x86   :  { %1083 = vmatprep.mubr.f32.mxu0 %v1284_v22  ;;  %1120 = vmatpush3.msra.mxu1 %v606_v55 }
  0x87   :  { %1121 = vmatprep.mubr.f32.mxu1 %v1284_v22  ;;  %1084 = vmatmul.mubr.f32.vlgmr.msra.gmra.mxu0 %v489_v59 }
  0x88   :  { %1122 = vmatmul.mubr.f32.vlgmr.msra.gmra.mxu1 %v489_v59  ;;  %1086 = vmatprep.mubr.f32.mxu0 %v492_v61 }
  0x89   :  { %1124 = vmatprep.mubr.f32.mxu1 %v492_v61 }
  0x8b   :  { %1087 = vmatmul.mubr.f32.gmra.mxu0 %v494_v62 }
  0x8c   :  { %1125 = vmatmul.mubr.f32.gmra.mxu1 %v494_v62 }
  0xff   :  { %v933_v15 = vpop.f32.mrf.mxu0 }
 0x100   :  { %v971_v63 = vpop.f32.mrf.mxu1 }
 0x101   :  { %v191_v19 = vpop.f32.mrf.mxu0  ;;  %v282_v12 = vadd.f32 %v971_v63, %v933_v15 }
 0x102   :  { %v276_v0 = vpop.f32.mrf.mxu1 }
 0x103   :  { %v277_v18 = vadd.f32 %v276_v0, %v191_v19 }
 0x11c   :  { %v936_v1 = vpop.f32.mrf.mxu0 }
 0x11d   :  { %v974_v2 = vpop.f32.mrf.mxu1 }
 0x11e   :  { %v201_v3 = vpop.f32.mrf.mxu0  ;;  %v292_v26 = vadd.f32 %v974_v2, %v936_v1 }
 0x11f   :  { %v286_v4 = vpop.f32.mrf.mxu1 }
 0x120   :  { %v287_v29 = vadd.f32 %v286_v4, %v201_v3 }
 0x123   :  { %v1009_v5 = vpop.f32.mrf.mxu0 }
 0x124   :  { %v1047_v6 = vpop.f32.mrf.mxu1 }
 0x125   :  { %v378_v7 = vpop.f32.mrf.mxu0  ;;  %v469_v13 = vadd.f32 %v1047_v6, %v1009_v5 }
 0x126   :  { %v463_v22 = vpop.f32.mrf.mxu1 }
 0x127   :  { %v464_v20 = vadd.f32 %v463_v22, %v378_v7 }
 0x13f   :  { %v1012_v8 = vpop.f32.mrf.mxu0 }
 0x140   :  { %v1050_v9 = vpop.f32.mrf.mxu1 }
 0x141   :  { %v388_v10 = vpop.f32.mrf.mxu0  ;;  %v479_v27 = vadd.f32 %v1050_v9, %v1012_v8 }
 0x142   :  { %v473_v11 = vpop.f32.mrf.mxu1 }
 0x143   :  { %v474_v32 = vadd.f32 %v473_v11, %v388_v10 }
 0x147   :  { %v1085_v16 = vpop.f32.mrf.mxu0 }
 0x148   :  { %v1123_v17 = vpop.f32.mrf.mxu1  ;;  %v602_v21 = vadd.f32 %v1085_v16, %v282_v12 }
 0x149   :  { %v708_v23 = vadd.f32 %v1123_v17, %v469_v13  ;;  %v582_v24 = vpop.f32.mrf.mxu0 }
 0x14a   :  { %v688_v25 = vpop.f32.mrf.mxu1  ;;  %712 = vst [vmem:[%s1374_s3 + $0x10] sm:$0xff] %v602_v21  ;;  %v601_v28 = vadd.f32 %v582_v24, %v277_v18  ;;  %v725_v38 = vmul.f32 %v602_v21, %v602_v21 }
 0x14b   :  { %740 = vst [vmem:[#allocation8 + $0x8] sm:$0xff] %v708_v23  ;;  %v707_v14 = vadd.f32 %v688_v25, %v464_v20  ;;  %v1088_v30 = vpop.f32.mrf.mxu0 }
 0x14c   :  { %v1126_v31 = vpop.f32.mrf.mxu1  ;;  %711 = vst [vmem:[%s1374_s3 + $0x8] sm:$0xff] %v601_v28  ;;  %v724_v33 = vmul.f32 %v601_v28, %v601_v28  ;;  %v604_v34 = vadd.f32 %v1088_v30, %v292_v26  ;;  %v715_v39 = vadd.f32 %v602_v21, %v601_v28 }
 0x14d   :  { %739 = vst [vmem:[#allocation8] sm:$0xff] %v707_v14  ;;  %v710_v35 = vadd.f32 %v1126_v31, %v479_v27  ;;  %v592_v36 = vpop.f32.mrf.mxu0 }
 0x14e   :  { %v698_v37 = vpop.f32.mrf.mxu1  ;;  %714 = vst [vmem:[%s1374_s3 + $0x30] sm:$0xff] %v604_v34  ;;  %v603_v40 = vadd.f32 %v592_v36, %v287_v29  ;;  %v728_v42 = vadd.f32 %v725_v38, %v724_v33 }
 0x14f   :  { %742 = vst [vmem:[#allocation8 + $0x18] sm:$0xff] %v710_v35  ;;  %v709_v41 = vadd.f32 %v698_v37, %v474_v32 }
 0x150   :  { %713 = vst [vmem:[%s1374_s3 + $0x28] sm:$0xff] %v603_v40  ;;  %v716_v43 = vadd.f32 %v715_v39, %v603_v40  ;;  %v726_v44 = vmul.f32 %v603_v40, %v603_v40 }
 0x151   :  { %741 = vst [vmem:[#allocation8 + $0x10] sm:$0xff] %v709_v41 }
 0x152   :  { %1184 = shalt.err (!%p1181_p0)
}
 0x153   :  { %766 = dma.vmem_to_hbm [thread:$0]  %s761_s23, 512, %s1376_s5, [#allocation9], %s1222_s21, %s1222_s21, %s1223_s22   ;;  %v727_v45 = vmul.f32 %v604_v34, %v604_v34  ;;  %v717_v46 = vadd.f32 %v716_v43, %v604_v34  ;;  %v729_v47 = vadd.f32 %v728_v42, %v726_v44 }
 0x154   :  { %s1226_s3 = smov [#allocation7]  }
 0x155   :  { %v718_v48 = vrot.slane %v717_v46, 4  ;;  %v730_v49 = vadd.f32 %v729_v47, %v727_v45  ;;  %s751_s6 = sshll.u32 %s1226_s3, 4  ;;  %s752_s6 = int_to_ptr.vmem [resolvable:$true] %s751_s6 }
 0x156   :  { %s1193_s5 = scalar_lea.vmem %s752_s6, 32  ;;  %p1198_p2 = scmp.lt.s32.totalorder %s752_s6, %s752_s6 }
 0x157   :  { %v719_v50 = vadd.f32 %v718_v48, %v717_v46  ;;  %v731_v51 = vrot.slane %v730_v49, 4  ;;  %p1194_p1 = scmp.ne.s32.totalorder %s752_s6, %s1193_s5  ;;  %p1199_p3 = scmp.lt.s32.totalorder %s1193_s5, %s1193_s5 }
 0x159   :  { %v720_v52 = vrot.slane %v719_v50, 2  ;;  %v732_v53 = vadd.f32 %v731_v51, %v730_v49  ;;  %p1200_p4 = por %p1199_p3, %p1198_p2 }
 0x15b   :  { %v721_v54 = vadd.f32 %v720_v52, %v719_v50  ;;  %v733_v55 = vrot.slane %v732_v53, 2  ;;  %p1201_p5 = pnand %p1200_p4, %p1194_p1 }
 0x15d   :  { %v722_v56 = vrot.slane %v721_v54, 1  ;;  %v734_v57 = vadd.f32 %v733_v55, %v732_v53 }
 0x15f   :  { %v735_v58 = vrot.slane %v734_v57, 1  ;;  %v723_v59 = vadd.f32 %v722_v56, %v721_v54 }
 0x161   :  { %v736_v60 = vadd.f32 %v735_v58, %v734_v57 }
 0x163   :  { %v737_v61 = vsel %vm61_vm1, %v723_v59, %v736_v60 }
 0x164   :  { %738 = vst [vmem:[#allocation7] sm:$0x3] %v737_v61 }
 0x165   :  { %1204 = shalt.err (!%p1201_p5)
}
 0x166   :  { %754 = dma.vmem_to_hbm [thread:$0]  %s752_s6, 32, %s1375_s4, [#allocation4]  }
 0x167   :  { %1217 = dma.done.wait [#allocation4], 32  }
 0x168   :  { %1218 = vsyncadd [#allocation4], 4294967264 }
 0x169   :  { %1219 = dma.done.wait [#allocation9], 512  }
 0x16a   :  { %1220 = vsyncadd [#allocation9], 4294966784 }
 0x16b   :  { %775 = vsyncpa [#allocation3], 1 }
 0x16c   :  { %776 = vsyncpa [#allocation6], 1 }
 0x16d   :  { %777 = vsyncpa [#allocation4], 1 }
 0x16e   :  { %778 = vsyncpa [#allocation9], 1 }

</bundles_post_ra>
